<compile_context>
chip_gen: v7x
topology: tpu7x:2x2x1
jax: 0.10.0
libtpu: 0.0.40
codegen_flags: <defaults>
</compile_context>

<pallas_src>
import functools
import math

import jax
import jax.numpy as jnp
from jax.experimental import pallas as pl
from jax.experimental.pallas import tpu as pltpu


# ----------------------------------------------------------------------------
# Helpers
# ----------------------------------------------------------------------------
def _round_up(n, m):
    return ((n + m - 1) // m) * m


def _row_tile(n, target=512):
    """Row (sublane) tile: full dim if small, else `target` (multiple of 8)."""
    if n <= target:
        return n, n
    return target, _round_up(n, target)


def _pad_rows(x, n_pad):
    n = x.shape[0]
    if n_pad == n:
        return x
    return jnp.pad(x, ((0, n_pad - n), (0, 0)))


def _vmem_limit(block_bytes):
    """Explicit VMEM budget: ~2x block bytes (double buffering) + headroom,
    clamped below v7x's 64 MiB physical VMEM."""
    return int(min(max(2 * int(block_bytes) + (4 << 20), 32 << 20), 60 << 20))


def _gelu(x):
    # tanh-approximation GELU (BERT's standard "gelu" activation).
    # TODO(synk): exact erf-based GELU if bit-parity with the torch reference is required.
    c = 0.7978845608028654  # sqrt(2/pi)
    return 0.5 * x * (1.0 + jnp.tanh(c * (x + 0.044715 * x * x * x)))


# ----------------------------------------------------------------------------
# Pallas kernels
# ----------------------------------------------------------------------------
def _linear_kernel(x_ref, w_ref, b_ref, o_ref, *, activation):
    """y = act(x @ W + b) with the whole weight resident in VMEM."""
    y = jnp.dot(x_ref[...], w_ref[...], preferred_element_type=jnp.float32)
    y = y + b_ref[...].astype(jnp.float32)
    if activation == "gelu":
        y = _gelu(y)
    o_ref[...] = y.astype(o_ref.dtype)


def _linear_ln_kernel(x_ref, w_ref, b_ref, r_ref, g_ref, bt_ref, o_ref, *, eps):
    """y = LayerNorm(x @ W + b + residual); resident weight, fused epilogue."""
    y = jnp.dot(x_ref[...], w_ref[...], preferred_element_type=jnp.float32)
    y = y + b_ref[...].astype(jnp.float32) + r_ref[...].astype(jnp.float32)
    mu = jnp.mean(y, axis=-1, keepdims=True)
    var = jnp.mean((y - mu) ** 2, axis=-1, keepdims=True)
    yn = (y - mu) * jax.lax.rsqrt(var + eps)
    o_ref[...] = (yn * g_ref[...].astype(jnp.float32)
                  + bt_ref[...].astype(jnp.float32)).astype(o_ref.dtype)


def _qkv_kernel(x_ref, wq_ref, bq_ref, wk_ref, bk_ref, wv_ref, bv_ref,
                q_ref, k_ref, v_ref, *, q_scale):
    """Fused Q/K/V projections: x read once, three resident weights.
    Q is pre-scaled by 1/sqrt(head_dim) so the attention kernel never scales
    the (S, S) score matrix."""
    x = x_ref[...]
    q = jnp.dot(x, wq_ref[...], preferred_element_type=jnp.float32)
    q = (q + bq_ref[...].astype(jnp.float32)) * q_scale
    q_ref[...] = q.astype(q_ref.dtype)
    k = jnp.dot(x, wk_ref[...], preferred_element_type=jnp.float32)
    k_ref[...] = (k + bk_ref[...].astype(jnp.float32)).astype(k_ref.dtype)
    v = jnp.dot(x, wv_ref[...], preferred_element_type=jnp.float32)
    v_ref[...] = (v + bv_ref[...].astype(jnp.float32)).astype(v_ref.dtype)


def _attention_kernel(q_ref, k_ref, v_ref, m_ref, o_ref, *, num_heads, head_dim):
    """Per-batch attention over all heads.

    q/k/v blocks are lane-dense (S, H) slabs; heads are static lane slices, so
    no HBM-level head transposes are needed and the context is written back as
    a lane-dense (S, H) slab.  BERT sequences (<= 512) fit one key block, so a
    plain single-pass softmax is used (no online-softmax bookkeeping).
    Q arrives pre-scaled by 1/sqrt(head_dim).
    """
    # TODO(synk): for sequences far beyond 512, re-introduce a kv-tiled
    # flash-style loop; also note Dh=64 contraction under-fills the MXU.
    bias = m_ref[0]                                     # (1, S) additive mask, f32
    for h in range(num_heads):                          # static unroll
        lo = h * head_dim
        hi = lo + head_dim
        q = q_ref[0, :, lo:hi]                          # (S, Dh) bf16, pre-scaled
        k = k_ref[0, :, lo:hi]
        v = v_ref[0, :, lo:hi]
        s = jax.lax.dot_general(
            q, k, dimension_numbers=(((1,), (1,)), ((), ())),
            preferred_element_type=jnp.float32)         # (S, S)
        s = s + bias
        m = jnp.max(s, axis=-1, keepdims=True)
        p = jnp.exp(s - m)
        l = jnp.sum(p, axis=-1, keepdims=True)
        ctx = jnp.dot(p.astype(v.dtype), v, preferred_element_type=jnp.float32)
        o_ref[0, :, lo:hi] = (ctx / l).astype(o_ref.dtype)   # exact divide


def _emb_ln_kernel(w_ref, t_ref, p_ref, g_ref, b_ref, o_ref, *, eps):
    """LayerNorm(word_emb + token_type_emb + position_emb) fused in one pass."""
    x = (w_ref[0].astype(jnp.float32) + t_ref[0].astype(jnp.float32)
         + p_ref[...].astype(jnp.float32))
    mu = jnp.mean(x, axis=-1, keepdims=True)
    var = jnp.mean((x - mu) ** 2, axis=-1, keepdims=True)
    y = (x - mu) * jax.lax.rsqrt(var + eps)
    o_ref[0] = (y * g_ref[...].astype(jnp.float32)
                + b_ref[...].astype(jnp.float32)).astype(o_ref.dtype)


# ----------------------------------------------------------------------------
# pallas_call wrappers
# ----------------------------------------------------------------------------
def linear(x, w, b, activation=None, out_dtype=None, row_target=512):
    n, k = x.shape
    m = w.shape[1]
    out_dtype = out_dtype or x.dtype
    out_isz = jnp.dtype(out_dtype).itemsize
    tm, n_pad = _row_tile(n, row_target)
    xp = _pad_rows(x, n_pad)

    block_bytes = (tm * k * x.dtype.itemsize + k * m * w.dtype.itemsize
                   + m * 4 + tm * m * out_isz)
    out = pl.pallas_call(
        functools.partial(_linear_kernel, activation=activation),
        out_shape=jax.ShapeDtypeStruct((n_pad, m), out_dtype),
        grid=(n_pad // tm,),
        in_specs=[
            pl.BlockSpec((tm, k), lambda i: (i, 0)),
            # Constant block index -> weight DMA'd once and stays VMEM-resident.
            pl.BlockSpec((k, m), lambda i: (0, 0)),
            pl.BlockSpec((1, m), lambda i: (0, 0)),
        ],
        out_specs=pl.BlockSpec((tm, m), lambda i: (i, 0)),
        compiler_params=pltpu.CompilerParams(
            dimension_semantics=("parallel",),
            vmem_limit_bytes=_vmem_limit(block_bytes)),
        cost_estimate=pl.CostEstimate(
            flops=int(2 * n_pad * m * k),
            transcendentals=int(n_pad * m) if activation == "gelu" else 0,
            bytes_accessed=int(n_pad * k * x.dtype.itemsize
                               + k * m * w.dtype.itemsize + m * 4
                               + n_pad * m * out_isz)),
    )(xp, w, b.reshape(1, m))
    return out[:n] if n_pad != n else out


def linear_add_layernorm(x, w, b, residual, gamma, beta, eps, row_target=512):
    """y = LayerNorm(x @ w + b + residual); weight fully VMEM-resident."""
    n, k = x.shape
    m = w.shape[1]
    tm, n_pad = _row_tile(n, row_target)
    xp = _pad_rows(x, n_pad)
    rp = _pad_rows(residual, n_pad)
    out_dtype = residual.dtype
    out_isz = jnp.dtype(out_dtype).itemsize

    block_bytes = (tm * k * x.dtype.itemsize + k * m * w.dtype.itemsize
                   + 3 * m * 4 + tm * m * residual.dtype.itemsize
                   + tm * m * out_isz)
    out = pl.pallas_call(
        functools.partial(_linear_ln_kernel, eps=eps),
        out_shape=jax.ShapeDtypeStruct((n_pad, m), out_dtype),
        grid=(n_pad // tm,),
        in_specs=[
            pl.BlockSpec((tm, k), lambda i: (i, 0)),
            pl.BlockSpec((k, m), lambda i: (0, 0)),   # resident weight
            pl.BlockSpec((1, m), lambda i: (0, 0)),
            pl.BlockSpec((tm, m), lambda i: (i, 0)),  # residual
            pl.BlockSpec((1, m), lambda i: (0, 0)),
            pl.BlockSpec((1, m), lambda i: (0, 0)),
        ],
        out_specs=pl.BlockSpec((tm, m), lambda i: (i, 0)),
        compiler_params=pltpu.CompilerParams(
            dimension_semantics=("parallel",),
            vmem_limit_bytes=_vmem_limit(block_bytes)),
        cost_estimate=pl.CostEstimate(
            flops=int(2 * n_pad * m * k + 10 * n_pad * m),
            transcendentals=int(n_pad),
            bytes_accessed=int(n_pad * k * x.dtype.itemsize
                               + k * m * w.dtype.itemsize + 3 * m * 4
                               + 2 * n_pad * m * out_isz)),
    )(xp, w, b.reshape(1, m), rp, gamma.reshape(1, m), beta.reshape(1, m))
    return out[:n] if n_pad != n else out


def qkv_projection(x, wq, bq, wk, bk, wv, bv, q_scale, row_target=512):
    """Fused Q/K/V projections: x streamed once, three resident (H, H) weights,
    three lane-dense (N, H) outputs, Q pre-scaled by 1/sqrt(head_dim)."""
    n, k = x.shape
    m = wq.shape[1]
    tm, n_pad = _row_tile(n, row_target)
    xp = _pad_rows(x, n_pad)
    isz = x.dtype.itemsize

    block_bytes = (tm * k * isz + 3 * (k * m * wq.dtype.itemsize + m * 4)
                   + 3 * tm * m * isz)
    outs = pl.pallas_call(
        functools.partial(_qkv_kernel, q_scale=q_scale),
        out_shape=tuple(jax.ShapeDtypeStruct((n_pad, m), x.dtype)
                        for _ in range(3)),
        grid=(n_pad // tm,),
        in_specs=[
            pl.BlockSpec((tm, k), lambda i: (i, 0)),
            pl.BlockSpec((k, m), lambda i: (0, 0)),   # wq (resident)
            pl.BlockSpec((1, m), lambda i: (0, 0)),   # bq
            pl.BlockSpec((k, m), lambda i: (0, 0)),   # wk (resident)
            pl.BlockSpec((1, m), lambda i: (0, 0)),   # bk
            pl.BlockSpec((k, m), lambda i: (0, 0)),   # wv (resident)
            pl.BlockSpec((1, m), lambda i: (0, 0)),   # bv
        ],
        out_specs=tuple(pl.BlockSpec((tm, m), lambda i: (i, 0))
                        for _ in range(3)),
        compiler_params=pltpu.CompilerParams(
            dimension_semantics=("parallel",),
            vmem_limit_bytes=_vmem_limit(block_bytes)),
        cost_estimate=pl.CostEstimate(
            flops=int(3 * 2 * n_pad * m * k),
            transcendentals=0,
            bytes_accessed=int(n_pad * k * isz
                               + 3 * (k * m * wq.dtype.itemsize + m * 4)
                               + 3 * n_pad * m * isz)),
    )(xp, wq, bq.reshape(1, m), wk, bk.reshape(1, m), wv, bv.reshape(1, m))
    q, kk, v = outs
    if n_pad != n:
        q, kk, v = q[:n], kk[:n], v[:n]
    return q, kk, v


def attention(q, k, v, ext_mask, num_heads):
    """Self-attention over lane-dense (B, S, H) slabs; grid over batch only."""
    B, S, H = q.shape
    Dh = H // num_heads
    isz = q.dtype.itemsize
    block_bytes = 4 * S * H * isz + S * 4 + 3 * S * S * 4 + S * Dh * 4
    return pl.pallas_call(
        functools.partial(_attention_kernel, num_heads=num_heads, head_dim=Dh),
        out_shape=jax.ShapeDtypeStruct((B, S, H), q.dtype),
        grid=(B,),
        in_specs=[
            pl.BlockSpec((1, S, H), lambda b: (b, 0, 0)),
            pl.BlockSpec((1, S, H), lambda b: (b, 0, 0)),
            pl.BlockSpec((1, S, H), lambda b: (b, 0, 0)),
            pl.BlockSpec((1, 1, S), lambda b: (b, 0, 0)),
        ],
        out_specs=pl.BlockSpec((1, S, H), lambda b: (b, 0, 0)),
        compiler_params=pltpu.CompilerParams(
            dimension_semantics=("parallel",),
            vmem_limit_bytes=_vmem_limit(block_bytes)),
    )(q, k, v, ext_mask)


def embed_layernorm(word_e, tok_e, pos_e, gamma, beta, eps,
                    out_dtype=jnp.bfloat16):
    """LayerNorm(word + token_type + position embeddings), fused."""
    B, S, H = word_e.shape
    isz = word_e.dtype.itemsize
    block_bytes = 3 * S * H * isz + 2 * H * 4 + S * H * jnp.dtype(out_dtype).itemsize
    return pl.pallas_call(
        functools.partial(_emb_ln_kernel, eps=eps),
        out_shape=jax.ShapeDtypeStruct((B, S, H), out_dtype),
        grid=(B,),
        in_specs=[
            pl.BlockSpec((1, S, H), lambda b: (b, 0, 0)),
            pl.BlockSpec((1, S, H), lambda b: (b, 0, 0)),
            pl.BlockSpec((S, H), lambda b: (0, 0)),
            pl.BlockSpec((1, H), lambda b: (0, 0)),
            pl.BlockSpec((1, H), lambda b: (0, 0)),
        ],
        out_specs=pl.BlockSpec((1, S, H), lambda b: (b, 0, 0)),
        compiler_params=pltpu.CompilerParams(
            dimension_semantics=("parallel",),
            vmem_limit_bytes=_vmem_limit(block_bytes)),
    )(word_e, tok_e, pos_e, gamma.reshape(1, H), beta.reshape(1, H))


# ----------------------------------------------------------------------------
# Parameter initialization (mirrors init_bert_weights):
#   Linear / Embedding weights ~ N(0, initializer_range); biases = 0;
#   LayerNorm gamma = 1, beta = 0.  Matmul weights are stored [in, out] so
#   kernels compute y = x @ W + b.  Weights bf16 (native MXU), biases/LN f32.
# ----------------------------------------------------------------------------
def init_params(key, cfg, num_labels):
    std = cfg["initializer_range"]
    H, I, V = cfg["hidden_size"], cfg["intermediate_size"], cfg["vocab_size"]
    wdt = jnp.bfloat16

    def nrm(k, shape):
        return (jax.random.normal(k, shape, jnp.float32) * std).astype(wdt)

    keys = jax.random.split(key, 3 + cfg["num_hidden_layers"] * 6 + 1)
    ki = iter(keys)

    params = {
        "word_emb": nrm(next(ki), (V, H)),
        "pos_emb": nrm(next(ki), (cfg["max_position_embeddings"], H)),
        "tok_emb": nrm(next(ki), (cfg["type_vocab_size"], H)),
        "emb_ln_g": jnp.ones((H,), jnp.float32),
        "emb_ln_b": jnp.zeros((H,), jnp.float32),
        "layers": [],
    }
    for _ in range(cfg["num_hidden_layers"]):
        lp = {
            "wq": nrm(next(ki), (H, H)), "bq": jnp.zeros((H,), jnp.float32),
            "wk": nrm(next(ki), (H, H)), "bk": jnp.zeros((H,), jnp.float32),
            "wv": nrm(next(ki), (H, H)), "bv": jnp.zeros((H,), jnp.float32),
            "wo": nrm(next(ki), (H, H)), "bo": jnp.zeros((H,), jnp.float32),
            "ln1_g": jnp.ones((H,), jnp.float32),
            "ln1_b": jnp.zeros((H,), jnp.float32),
            "wi": nrm(next(ki), (H, I)), "bi": jnp.zeros((I,), jnp.float32),
            "wf": nrm(next(ki), (I, H)), "bf": jnp.zeros((H,), jnp.float32),
            "ln2_g": jnp.ones((H,), jnp.float32),
            "ln2_b": jnp.zeros((H,), jnp.float32),
        }
        params["layers"].append(lp)
    params["cls_w"] = nrm(next(ki), (H, num_labels))
    params["cls_b"] = jnp.zeros((num_labels,), jnp.float32)
    return params


# ----------------------------------------------------------------------------
# Forward pass (BertForTokenClassification.forward with labels=None)
# ----------------------------------------------------------------------------
def bert_token_classification_forward(params, cfg, input_ids,
                                      token_type_ids=None,
                                      attention_mask=None):
    B, S = input_ids.shape
    H = cfg["hidden_size"]
    nH = cfg["num_attention_heads"]
    Dh = H // nH
    eps = cfg["layer_norm_eps"]
    num_labels = params["cls_w"].shape[1]

    if token_type_ids is None:
        token_type_ids = jnp.zeros_like(input_ids)
    if attention_mask is None:
        # Matches BertModel.forward: (input_ids > 0) when attention_mask is None.
        attention_mask = (input_ids > 0).astype(jnp.float32)
    ext_mask = ((1.0 - attention_mask.astype(jnp.float32)) * -10000.0
                ).reshape(B, 1, S)

    # --- embeddings: gathers are XLA glue; sum + LayerNorm fused in one kernel ---
    word_e = jnp.take(params["word_emb"], input_ids, axis=0)       # (B, S, H) bf16
    tok_e = jnp.take(params["tok_emb"], token_type_ids, axis=0)    # (B, S, H) bf16
    pos_e = params["pos_emb"][:S]                                  # (S, H)    bf16
    h = embed_layernorm(word_e, tok_e, pos_e,
                        params["emb_ln_g"], params["emb_ln_b"], eps)
    h = h.reshape(B * S, H)

    # --- encoder layers ---
    q_scale = 1.0 / math.sqrt(Dh)
    for lp in params["layers"]:
        q, k, v = qkv_projection(h, lp["wq"], lp["bq"], lp["wk"], lp["bk"],
                                 lp["wv"], lp["bv"], q_scale)
        ctx = attention(q.reshape(B, S, H), k.reshape(B, S, H),
                        v.reshape(B, S, H), ext_mask, nH)
        # output projection with fused bias + residual + LayerNorm epilogue
        h = linear_add_layernorm(ctx.reshape(B * S, H), lp["wo"], lp["bo"], h,
                                 lp["ln1_g"], lp["ln1_b"], eps)
        inter = linear(h, lp["wi"], lp["bi"], activation="gelu")
        h = linear_add_layernorm(inter, lp["wf"], lp["bf"], h,
                                 lp["ln2_g"], lp["ln2_b"], eps)

    # Dropout is identity at inference.  BertModel's pooled output is discarded
    # by BertForTokenClassification, so it is not computed.
    logits = linear(h, params["cls_w"], params["cls_b"], out_dtype=jnp.float32)
    return logits.reshape(B, S, num_labels)


# ----------------------------------------------------------------------------
if __name__ == "__main__":
    cfg = dict(
        vocab_size=128,
        hidden_size=32,
        num_hidden_layers=2,
        num_attention_heads=2,
        intermediate_size=64,
        max_position_embeddings=64,
        type_vocab_size=2,
        layer_norm_eps=1e-12,
        initializer_range=0.02,
    )
    num_labels = 8
    B, S = 2, 8

    root = jax.random.PRNGKey(0)
    kp, kid, ktok = jax.random.split(root, 3)
    params = init_params(kp, cfg, num_labels)

    input_ids = jax.random.randint(kid, (B, S), 0, cfg["vocab_size"],
                                   dtype=jnp.int32)
    token_type_ids = jax.random.randint(ktok, (B, S), 0, cfg["type_vocab_size"],
                                        dtype=jnp.int32)

    logits = bert_token_classification_forward(params, cfg, input_ids,
                                               token_type_ids)
    jax.block_until_ready(logits)
    assert logits.shape == (B, S, num_labels)
    assert bool(jnp.all(jnp.isfinite(logits)))
    print("KERNEL_OK")
</pallas_src>

<mosaic_0001>
module attributes {stable_mosaic.version = 11 : i64} {
  func.func @_emb_ln_kernel(%arg0: i32, %arg1: memref<1x8x32xbf16, #tpu.memory_space<vmem>>, %arg2: memref<1x8x32xbf16, #tpu.memory_space<vmem>>, %arg3: memref<8x32xbf16, #tpu.memory_space<vmem>>, %arg4: memref<1x32xf32, #tpu.memory_space<vmem>>, %arg5: memref<1x32xf32, #tpu.memory_space<vmem>>, %arg6: memref<1x8x32xbf16, #tpu.memory_space<vmem>>) attributes {dimension_semantics = [#tpu.dimension_semantics<parallel>], iteration_bounds = array<i64: 2>, scalar_prefetch = 0 : i64, scratch_operands = 0 : i64, tpu.core_type = #tpu.core_type<tc>, window_params = [{transform_indices = @transform_0, window_bounds = array<i64: 1, 8, 32>}, {transform_indices = @transform_1, window_bounds = array<i64: 1, 8, 32>}, {pipeline_mode = #tpu.pipeline_mode<synchronous>, transform_indices = @transform_2, window_bounds = array<i64: 8, 32>}, {pipeline_mode = #tpu.pipeline_mode<synchronous>, transform_indices = @transform_3, window_bounds = array<i64: 1, 32>}, {pipeline_mode = #tpu.pipeline_mode<synchronous>, transform_indices = @transform_4, window_bounds = array<i64: 1, 32>}, {transform_indices = @transform_5, window_bounds = array<i64: 1, 8, 32>}]} {
    %c0 = arith.constant 0 : index
    %c0_0 = arith.constant 0 : index
    %c0_1 = arith.constant 0 : index
    %0 = vector.load %arg1[%c0, %c0_0, %c0_1] : memref<1x8x32xbf16, #tpu.memory_space<vmem>>, vector<1x8x32xbf16>
    %1 = vector.shape_cast %0 : vector<1x8x32xbf16> to vector<8x32xbf16>
    %2 = arith.extf %1 : vector<8x32xbf16> to vector<8x32xf32>
    %c0_2 = arith.constant 0 : index
    %c0_3 = arith.constant 0 : index
    %c0_4 = arith.constant 0 : index
    %3 = vector.load %arg2[%c0_2, %c0_3, %c0_4] : memref<1x8x32xbf16, #tpu.memory_space<vmem>>, vector<1x8x32xbf16>
    %4 = vector.shape_cast %3 : vector<1x8x32xbf16> to vector<8x32xbf16>
    %5 = arith.extf %4 : vector<8x32xbf16> to vector<8x32xf32>
    %6 = arith.addf %2, %5 : vector<8x32xf32>
    %c0_5 = arith.constant 0 : index
    %c0_6 = arith.constant 0 : index
    %7 = vector.load %arg3[%c0_5, %c0_6] : memref<8x32xbf16, #tpu.memory_space<vmem>>, vector<8x32xbf16>
    %8 = arith.extf %7 : vector<8x32xbf16> to vector<8x32xf32>
    %9 = arith.addf %6, %8 : vector<8x32xf32>
    %cst = arith.constant dense<0.000000e+00> : vector<8xf32>
    %10 = vector.multi_reduction <add>, %9, %cst [1] : vector<8x32xf32> to vector<8xf32>
    %11 = vector.shape_cast %10 : vector<8xf32> to vector<8x1xf32>
    %cst_7 = arith.constant 3.200000e+01 : f32
    %12 = vector.broadcast %cst_7 : f32 to vector<8x1xf32>
    %13 = arith.divf %11, %12 : vector<8x1xf32>
    %14 = vector.broadcast %13 : vector<8x1xf32> to vector<8x32xf32>
    %15 = arith.subf %9, %14 : vector<8x32xf32>
    %16 = arith.mulf %15, %15 : vector<8x32xf32>
    %cst_8 = arith.constant dense<0.000000e+00> : vector<8xf32>
    %17 = vector.multi_reduction <add>, %16, %cst_8 [1] : vector<8x32xf32> to vector<8xf32>
    %18 = vector.shape_cast %17 : vector<8xf32> to vector<8x1xf32>
    %cst_9 = arith.constant 3.200000e+01 : f32
    %19 = vector.broadcast %cst_9 : f32 to vector<8x1xf32>
    %20 = arith.divf %18, %19 : vector<8x1xf32>
    %21 = vector.broadcast %13 : vector<8x1xf32> to vector<8x32xf32>
    %22 = arith.subf %9, %21 : vector<8x32xf32>
    %cst_10 = arith.constant 9.99999996E-13 : f32
    %23 = vector.broadcast %cst_10 : f32 to vector<8x1xf32>
    %24 = arith.addf %20, %23 : vector<8x1xf32>
    %25 = math.rsqrt %24 : vector<8x1xf32>
    %26 = vector.broadcast %25 : vector<8x1xf32> to vector<8x32xf32>
    %27 = arith.mulf %22, %26 : vector<8x32xf32>
    %c0_11 = arith.constant 0 : index
    %c0_12 = arith.constant 0 : index
    %28 = vector.load %arg4[%c0_11, %c0_12] : memref<1x32xf32, #tpu.memory_space<vmem>>, vector<1x32xf32>
    %29 = vector.broadcast %28 : vector<1x32xf32> to vector<8x32xf32>
    %30 = arith.mulf %27, %29 : vector<8x32xf32>
    %c0_13 = arith.constant 0 : index
    %c0_14 = arith.constant 0 : index
    %31 = vector.load %arg5[%c0_13, %c0_14] : memref<1x32xf32, #tpu.memory_space<vmem>>, vector<1x32xf32>
    %32 = vector.broadcast %31 : vector<1x32xf32> to vector<8x32xf32>
    %33 = arith.addf %30, %32 : vector<8x32xf32>
    %34 = arith.truncf %33 : vector<8x32xf32> to vector<8x32xbf16>
    %c0_15 = arith.constant 0 : index
    %c0_16 = arith.constant 0 : index
    %c0_17 = arith.constant 0 : index
    %35 = vector.load %arg6[%c0_15, %c0_16, %c0_17] : memref<1x8x32xbf16, #tpu.memory_space<vmem>>, vector<1x8x32xbf16>
    %36 = vector.shape_cast %35 : vector<1x8x32xbf16> to vector<8x32xbf16>
    %37 = vector.shape_cast %34 : vector<8x32xbf16> to vector<1x8x32xbf16>
    tpu.vector_store %arg6[%c0_15, %c0_16, %c0_17], %37 {strides = array<i32>} : memref<1x8x32xbf16, #tpu.memory_space<vmem>>, vector<1x8x32xbf16>,
    return
  }
  func.func @transform_0(%arg0: i32) -> (i32, i32, i32) {
    %c0_i32 = arith.constant 0 : i32
    %c0_i32_0 = arith.constant 0 : i32
    %c0_i32_1 = arith.constant 0 : i32
    return %arg0, %c0_i32, %c0_i32_0 : i32, i32, i32
  }
  func.func @transform_1(%arg0: i32) -> (i32, i32, i32) {
    %c0_i32 = arith.constant 0 : i32
    %c0_i32_0 = arith.constant 0 : i32
    %c0_i32_1 = arith.constant 0 : i32
    return %arg0, %c0_i32, %c0_i32_0 : i32, i32, i32
  }
  func.func @transform_2(%arg0: i32) -> (i32, i32) {
    %c0_i32 = arith.constant 0 : i32
    %c0_i32_0 = arith.constant 0 : i32
    %c0_i32_1 = arith.constant 0 : i32
    return %c0_i32, %c0_i32_0 : i32, i32
  }
  func.func @transform_3(%arg0: i32) -> (i32, i32) {
    %c0_i32 = arith.constant 0 : i32
    %c0_i32_0 = arith.constant 0 : i32
    %c0_i32_1 = arith.constant 0 : i32
    return %c0_i32, %c0_i32_0 : i32, i32
  }
  func.func @transform_4(%arg0: i32) -> (i32, i32) {
    %c0_i32 = arith.constant 0 : i32
    %c0_i32_0 = arith.constant 0 : i32
    %c0_i32_1 = arith.constant 0 : i32
    return %c0_i32, %c0_i32_0 : i32, i32
  }
  func.func @transform_5(%arg0: i32) -> (i32, i32, i32) {
    %c0_i32 = arith.constant 0 : i32
    %c0_i32_0 = arith.constant 0 : i32
    %c0_i32_1 = arith.constant 0 : i32
    return %arg0, %c0_i32, %c0_i32_0 : i32, i32, i32
  }
}

</mosaic_0001>

<bundles_post_ra>
// kernel: tpu_custom_call.1
= control target key start
LH: loop header
LB: loop body
LE: loop exit
PB: predicated region body
PF: predicated region fallthrough
CT: control target
= control target key end

     0   :  { %10 = vsyncpa [#allocation3], 0  ;;  %s884_s0 = inlined_call_operand.hbm [shape: bf16[2,8,32], index: 0, kind: input, shape index: {}]   ;;  %s885_s1 = inlined_call_operand.hbm [shape: bf16[2,8,32], index: 1, kind: input, shape index: {}]   ;;  %s886_s2 = inlined_call_operand.vmem [shape: bf16[8,32], index: 2, kind: input, shape index: {}]   ;;  %s887_s3 = inlined_call_operand.vmem [shape: f32[1,32], index: 3, kind: input, shape index: {}]   ;;  %s888_s4 = inlined_call_operand.vmem [shape: f32[1,32], index: 4, kind: input, shape index: {}]   ;;  %s889_s5 = inlined_call_operand.hbm [shape: bf16[2,8,32], index: 5, kind: output, shape index: {}]  }
   0x1   :  { %12 = vsyncpa [#allocation3 + $0x1], 0 }
   0x2   :  { %13 = vsyncpa [#allocation6], 0 }
   0x3   :  { %15 = vsyncpa [#allocation6 + $0x1], 0 }
   0x4   :  { %16 = vsyncpa [#allocation4], 0 }
   0x5   :  { %18 = vsyncpa [#allocation4 + $0x1], 0  ;;  %s661_s18 = smov 0   ;;  %s663_s19 = smov 0  }
   0x6   :  { %s665_s20 = smov 0   ;;  %s667_s21 = smov 0  }
   0x7 LB: > { %s682_s22 = sadd.s32 4294967295, %s626_s21   ;;  %s426_s23 = sadd.s32 4294967294, %s626_s21   ;;  %s626_s21 = sphi %s667_s21, %s908_s21   ;;  %s622_s20 = sphi %s665_s20, %s907_s20   ;;  %s618_s19 = sphi %s663_s19, %s906_s19   ;;  %s614_s18 = sphi %s661_s18, %s905_s18  }
   0x8   : > { %s686_s24 = sadd.s32 1, %s626_s21   ;;  %s31_s25 = sadd.s32 1, %s622_s20 }
   0x9   : > { %s28_s26 = ssub.s32 %s626_s21, %s686_s24  ;;  %p38_p0 = scmp.ne.s32.totalorder %s622_s20, %s618_s19 }
   0xa   : > { %p29_p1 = scmp.eq.s32.totalorder %s28_s26, 0  ;;  %p39_p2 = scmp.eq.s32.totalorder %s626_s21, 0 }
   0xb   : > { %p44_p3 = scmp.ne.s32.totalorder %s618_s19, %s614_s18  ;;  %p45_p4 = scmp.eq.s32.totalorder %s682_s22, 0 }
   0xc   : > { %s698_s27 = scalar_select %p29_p1, %s622_s20, %s31_s25  }
   0xd   : > { %p700_p5 = por %p39_p2, %p38_p0  ;;  %p704_p6 = por %p45_p4, %p44_p3 }
   0xe   : > { %p157_p7 = scmp.eq.s32.totalorder %s682_s22, 1  ;;  %p163_p8 = scmp.eq.s32.totalorder %s426_s23, 1 }
   0xf   : > { %s893_s29 = scalar_select %p704_p6, 1, 0 }
  0x10   : > { %p460_p10 = scmp.lt.s32.totalorder %s626_s21, 2  ;;  %p711_p11 = por %p157_p7, %p38_p0 }
  0x11   : > { %p715_p12 = por %p163_p8, %p44_p3  ;;  %s720_s7 = sand.u32 1, %s622_s20  }
  0x12   : > { %s894_s30 = scalar_select %p711_p11, 1, 0 }
  0x13   : > { %s895_s6 = scalar_select %p715_p12, 1, 0 }
  0x14   : > { %s430_s8 = sshll.u32 %s626_s21, 6  ;;  %s429_s9 = sshll.u32 %s720_s7, 2 }
  0x15   : > { %s729_s12 = scalar_lea.hbm %s884_s0, %s430_s8  ;;  %s196_s13 = scalar_lea.vmem [#allocation2], %s429_s9 }
  0x16   : > { %s203_s14 = sshll.u32 %s196_s13, 4  ;;  %p735_p13 = pnand %p460_p10, %p700_p5  ;;  %s739_s14 = int_to_ptr.vmem [resolvable:$true] %s203_s14 }
  0x17   : > { %s193_s16 = scalar_lea.sflag [#allocation3], %s720_s7  ;;  %s496_s17 = scalar_lea.hbm %s729_s12, 64 }
  0x18   : > { %p497_p2 = scmp.ne.s32.totalorder %s729_s12, %s496_s17  ;;  %p498_p3 = pneg %p735_p13 }
  0x19   : > { %s501_s26 = scalar_lea.hbm %s884_s0, 128  ;;  %p502_p5 = scmp.lt.u32.totalorder %s729_s12, %s884_s0 }
  0x1a   : > { %p499_p4 = pnand %p498_p3, %p497_p2  ;;  %p503_p8 = scmp.lt.u32.totalorder %s501_s26, %s496_s17 }
  0x1b   : > { %p505_p9 = scmp.lt.u32.totalorder %s496_s17, %s729_s12 }
  0x1c   : > { %p500_p7 = pneg %p499_p4  ;;  %p504_p10 = por %p503_p8, %p502_p5 }
  0x1e   : > { %p506_p0 = por %p505_p9, %p504_p10 }
  0x20   : > { %p507_p1 = pnand %p506_p0, %p500_p7 }
  0x22   : > { %510 = shalt.err (!%p507_p1)
}
  0x23   : > { %s511_s11 = scalar_lea.vmem %s739_s14, 64  ;;  %s628_s13 = smov [#allocation2]  }
  0x24   : > { %p512_p2 = scmp.ne.s32.totalorder %s739_s14, %s511_s11  ;;  %s516_s23 = sshll.u32 %s628_s13, 4  ;;  %s517_s23 = int_to_ptr.vmem [resolvable:$false] %s516_s23 }
  0x25   : > { %s518_s25 = scalar_lea.vmem %s517_s23, 128  ;;  %p519_p11 = scmp.lt.s32.totalorder %s739_s14, %s517_s23 }
  0x26   : > { %p514_p4 = pnand %p512_p2, %p498_p3  ;;  %p520_p5 = scmp.lt.s32.totalorder %s518_s25, %s511_s11 }
  0x28   : > { %p515_p12 = pneg %p514_p4  ;;  %p521_p8 = por %p520_p5, %p519_p11 }
  0x2a   : > { %p522_p9 = pnand %p521_p8, %p515_p12 }
  0x2c   : > { %525 = shalt.err (!%p522_p9)
}
  0x2d   : > { %452 = dma.hbm_to_vmem [thread:$0]  (!%p735_p13), %s729_s12, 64, %s739_s14, %s193_s16  }
  0x2e   : > { %p897_p0 = scmp.lt.s32.totalorder %s626_s21, 3  ;;  %p898_p1 = scmp.ge.s32.totalorder %s626_s21, 1 }
  0x2f   : > { %s782_s10 = scalar_lea.hbm %s885_s1, %s430_s8  ;;  %s214_s11 = scalar_lea.vmem [#allocation5], %s429_s9 }
  0x30   : > { %p773_p7 = pnand %p898_p1, %p897_p0  ;;  %s221_s13 = sshll.u32 %s214_s11, 4  ;;  %s222_s13 = int_to_ptr.vmem [resolvable:$true] %s221_s13 }
  0x31   : > { %s211_s12 = scalar_lea.sflag [#allocation6], %s720_s7  ;;  %s526_s14 = scalar_lea.hbm %s782_s10, 64 }
  0x32   : > { %s899_s17 = scalar_select %p773_p7, 1, 0 }
  0x33   : > { %p527_p11 = scmp.ne.s32.totalorder %s782_s10, %s526_s14  ;;  %s531_s8 = scalar_lea.hbm %s885_s1, 128 }
  0x34   : > { %p532_p2 = scmp.lt.u32.totalorder %s782_s10, %s885_s1  ;;  %p533_p4 = scmp.lt.u32.totalorder %s531_s8, %s526_s14 }
  0x35   : > { %p529_p12 = pnand %p527_p11, %p498_p3  ;;  %p535_p8 = scmp.lt.u32.totalorder %s526_s14, %s782_s10 }
  0x36   : > { %p534_p5 = por %p533_p4, %p532_p2 }
  0x37   : > { %p530_p10 = pneg %p529_p12 }
  0x38   : > { %p536_p9 = por %p535_p8, %p534_p5 }
  0x3a   : > { %p537_p0 = pnand %p536_p9, %p530_p10 }
  0x3c   : > { %540 = shalt.err (!%p537_p0)
}
  0x3d   : > { %s541_s7 = scalar_lea.vmem %s222_s13, 64  ;;  %s629_s9 = smov [#allocation5]  }
  0x3e   : > { %p542_p1 = scmp.ne.s32.totalorder %s222_s13, %s541_s7  ;;  %s546_s28 = sshll.u32 %s629_s9, 4  ;;  %s547_s28 = int_to_ptr.vmem [resolvable:$false] %s546_s28 }
  0x3f   : > { %s548_s11 = scalar_lea.vmem %s547_s28, 128  ;;  %p549_p6 = scmp.lt.s32.totalorder %s222_s13, %s547_s28 }
  0x40   : > { %p544_p11 = pnand %p542_p1, %p498_p3  ;;  %p550_p7 = scmp.lt.s32.totalorder %s548_s11, %s541_s7 }
  0x42   : > { %p545_p12 = pneg %p544_p11  ;;  %p551_p2 = por %p550_p7, %p549_p6 }
  0x44   : > { %p552_p4 = pnand %p551_p2, %p545_p12 }
  0x46   : > { %555 = shalt.err (!%p552_p4)
}
  0x47   : > { %455 = dma.hbm_to_vmem [thread:$0]  (!%p735_p13), %s782_s10, 64, %s222_s13, %s211_s12  }
  0x48   : > { %p900_p10 = scmp.ne.s32.totalorder %s899_s17, 0 }
  0x49   : > { %s809_s14 = sand.u32 (!%p900_p10), 1, %s618_s19   ;;  %p901_p6 = scmp.ne.s32.totalorder (!%p900_p10), %s893_s29, 0 }
  0x4a   : > { %230 = sbr.rel (%p900_p10) target bundleno = 420 (0x1a4), region = 40  ;;  %s812_s16 = sshll.u32 (!%p900_p10), %s809_s14, 2 }
  0x4b   : > { %s233_s23 = scalar_lea.sflag (!%p900_p10), [#allocation3], %s809_s14  ;;  %s236_s8 = scalar_lea.vmem (!%p900_p10), [#allocation2], %s812_s16 }
  0x51   : > { %601 = dma.done.wait (%p901_p6), %s233_s23, 64  }
  0x52   : > { %603 = vsyncadd (%p901_p6), %s233_s23, 4294967232  ;;  %s242_s15 = scalar_lea.sflag [#allocation6], %s809_s14  ;;  %s245_s17 = scalar_lea.vmem [#allocation5], %s812_s16 }
  0x53   : > { %605 = dma.done.wait (%p901_p6), %s242_s15, 64  }
  0x54   : > { %607 = vsyncadd (%p901_p6), %s242_s15, 4294967232  ;;  %v277_v0 = vld [vmem:[%s236_s8] sm:$0xf]  ;;  %v279_v1 = vld [vmem:[%s245_s17] sm:$0xf]  ;;  %vm285_vm0 = vcmask 261120  }
  0x55   : > { %v282_v2 = vld [vmem:[%s886_s2] sm:$0xf]  ;;  %v278_v3 = vunpack.c.l.bf16 %v277_v0  ;;  %v280_v4 = vunpack.c.l.bf16 %v279_v1  ;;  %s440_s7 = sshll.u32 %s682_s22, 6  ;;  %s276_s9 = scalar_lea.vmem [#allocation7], %s812_s16  ;;  %vm317_vm1 = vcmask 257024  }
  0x56   : > { %v283_v5 = vunpack.c.l.bf16 %v282_v2  ;;  %v437_v18 = vld [vmem:[%s887_s3] ss:$0 sm:$0xff]  ;;  %s333_s28 = sshll.u32 %s276_s9, 4  ;;  %s840_s8 = scalar_lea.hbm %s889_s5, %s440_s7  ;;  %s842_s28 = int_to_ptr.vmem [resolvable:$true] %s333_s28 }
  0x57   : > { %v281_v6 = vadd.f32 %v280_v4, %v278_v3  ;;  %v438_v20 = vld [vmem:[%s888_s4] ss:$0 sm:$0xff]  ;;  %s320_s15 = scalar_lea.sflag [#allocation4], %s809_s14  ;;  %s556_s17 = scalar_lea.vmem %s842_s28, 64 }
  0x58   : > { %p557_p13 = scmp.ne.s32.totalorder %s842_s28, %s556_s17  ;;  %p902_p3 = scmp.ne.s32.totalorder %s894_s30, 0 }
  0x59   : > { %v284_v7 = vadd.f32 %v283_v5, %v281_v6  ;;  %s630_s22 = smov [#allocation7]  }
  0x5a   : > { %p558_p7 = pnand %p557_p13, %p902_p3  ;;  %s560_s16 = sshll.u32 %s630_s22, 4  ;;  %s561_s16 = int_to_ptr.vmem [resolvable:$false] %s560_s16 }
  0x5b   : > { %v286_v8 = vsel %vm285_vm0, %v284_v7, 0.0  ;;  %s562_s10 = scalar_lea.vmem %s561_s16, 128  ;;  %p563_p8 = scmp.lt.s32.totalorder %s842_s28, %s561_s16 }
  0x5c   : > { %287 = vadd.xlane.f32.xlu0 %v286_v8  ;;  %p559_p5 = pneg %p558_p7  ;;  %p564_p9 = scmp.lt.s32.totalorder %s562_s10, %s556_s17 }
  0x5e   : > { %p565_p0 = por %p564_p9, %p563_p8 }
  0x60   : > { %p566_p1 = pnand %p565_p0, %p559_p5 }
  0xe9   : > { %v288_v9 = vpop.xlane.xlu0 %287 }
  0xea   : > { %v290_v10 = vmul.f32 0.03125, %v288_v9 }
  0xec   : > { %v291_v11 = vsub.f32 %v284_v7, %v290_v10 }
  0xee   : > { %v292_v12 = vmul.f32 %v291_v11, %v291_v11 }
  0xf0   : > { %v293_v13 = vsel %vm285_vm0, %v292_v12, 0.0 }
  0xf1   : > { %294 = vadd.xlane.f32.xlu0 %v293_v13 }
 0x17e   : > { %v295_v14 = vpop.xlane.xlu0 %294 }
 0x17f   : > { %v296_v15 = vmul.f32 0.03125, %v295_v14 }
 0x181   : > { %v297_v16 = vadd.f32 1e-12, %v296_v15 }
 0x183   : > { %494 = vrsqrt.f32 %v297_v16 }
 0x18d   : > { %v495_v17 = vpop.eup %494 }
 0x18e   : > { %v299_v19 = vmul.f32 %v495_v17, %v291_v11 }
 0x190   : > { %v307_v21 = vmul.f32 %v437_v18, %v299_v19 }
 0x192   : > { %v315_v22 = vadd.f32 %v438_v20, %v307_v21 }
 0x194   : > { %v316_v23 = vpack.c.bf16 %v315_v22, %v315_v22 }
 0x196   : > { %318 = vst.msk [vmem:[%s276_s9] sm:$0xf] %vm317_vm1, %v316_v23 }
 0x197   : > { %569 = shalt.err (!%p566_p1)
}
 0x198   : > { %s570_s14 = scalar_lea.hbm %s840_s8, 64  ;;  %s574_s12 = scalar_lea.hbm %s889_s5, 128 }
 0x199   : > { %p571_p11 = scmp.ne.s32.totalorder %s840_s8, %s570_s14  ;;  %p575_p4 = scmp.lt.u32.totalorder %s840_s8, %s889_s5 }
 0x19a   : > { %p576_p10 = scmp.lt.u32.totalorder %s574_s12, %s570_s14  ;;  %p578_p13 = scmp.lt.u32.totalorder %s570_s14, %s840_s8 }
 0x19b   : > { %p572_p12 = pnand %p571_p11, %p902_p3 }
 0x19c   : > { %p577_p6 = por %p576_p10, %p575_p4 }
 0x19d   : > { %p573_p2 = pneg %p572_p12 }
 0x19e   : > { %p579_p7 = por %p578_p13, %p577_p6 }
 0x1a0   : > { %p580_p5 = pnand %p579_p7, %p573_p2 }
 0x1a2   : > { %583 = shalt.err (!%p580_p5)
}
 0x1a3   : > { %447 = dma.vmem_to_hbm [thread:$0]  (%p902_p3), %s842_s28, 64, %s840_s8, %s320_s15  }
 0x1a4 PF: > { %s345_s7 = sand.u32 1, %s614_s18   ;;  %p903_p8 = scmp.ne.s32.totalorder %s895_s6, 0 }
 0x1a5   : > { %p904_p9 = scmp.ge.s32.totalorder %s626_s21, 2  ;;  %s346_s9 = scalar_lea.sflag [#allocation4], %s345_s7 }
 0x1a7   : > { %p457_p0 = pnand %p904_p9, %p903_p8 }
 0x1a9   : > { %609 = dma.done.wait (!%p457_p0), %s346_s9, 64  }
 0x1aa   : > { %611 = vsyncadd (!%p457_p0), %s346_s9, 4294967232  ;;  %p21_p1 = scmp.ge.s32.totalorder %s686_s24, 4   ;;  %s905_s18 = smov %s618_s19 }
 0x1ab   : > { %s906_s19 = smov %s622_s20  ;;  %s907_s20 = smov %s698_s27 }
 0x1ac   : > { %s908_s21 = smov %s686_s24  ;;  %23 = sbr.rel (!%p21_p1) target bundleno = 7 (0x7), region = 98 }
 0x1b3   :  { %351 = vsyncpa [#allocation3], 1 }
 0x1b4   :  { %353 = vsyncpa [#allocation3 + $0x1], 1 }
 0x1b5   :  { %354 = vsyncpa [#allocation6], 1 }
 0x1b6   :  { %356 = vsyncpa [#allocation6 + $0x1], 1 }
 0x1b7   :  { %357 = vsyncpa [#allocation4], 1 }
 0x1b8   :  { %359 = vsyncpa [#allocation4 + $0x1], 1 }

</bundles_post_ra>
